<compile_context>
chip_gen: v7x
topology: tpu7x:2x2x1
jax: 0.10.0
libtpu: 0.0.40
codegen_flags: <defaults>
</compile_context>

<pallas_src>
import functools

import numpy as np
import jax
import jax.numpy as jnp
from jax.experimental import pallas as pl
from jax.experimental.pallas import tpu as pltpu


def _round_up(a, b):
    return ((a + b - 1) // b) * b


def _dsconv_kernel(xb_ref, xh_ref, wdw_ref, wpw_ref, bpw_ref, o_ref, xw_ref,
                   *, TL, CH, HB, K, relu, use_bf16):
    # xb_ref : (1, TL, Cin_p)   body rows [l*TL, (l+1)*TL) of the padded input
    # xh_ref : (1, HB, Cin_p)   halo rows [(l+1)*TL, (l+1)*TL + HB)
    # wdw_ref: (K, Cin_p)       depthwise taps (tap, channel)
    # wpw_ref: (Cin_p, Cout_p)  pointwise weights
    # bpw_ref: (1, Cout_p)      fused bias (= b_pw + b_dw @ w_pw)
    # o_ref  : (1, TL, Cout_p)
    # xw_ref : small VMEM scratch for chunks whose FIR window crosses the tile.

    wdw = wdw_ref[...]                       # (K, Cin_p)
    wpw = wpw_ref[...]                       # (Cin_p, Cout_p)
    bpw = bpw_ref[...]                       # (1, Cout_p)
    if use_bf16:
        wpw = wpw.astype(jnp.bfloat16)

    for r0 in range(0, TL, CH):              # static unroll, few iterations
        ch = min(CH, TL - r0)
        if r0 + ch + K - 1 > TL:
            # FIR window spills past the tile: assemble body tail + halo once
            # in a small scratch window (all offsets sublane-aligned).
            body = TL - r0
            xw_ref[0:body, :] = xb_ref[0, r0:TL, :]
            xw_ref[body:body + HB, :] = xh_ref[0]
            y = xw_ref[0:ch, :] * wdw[0:1, :]
            for t in range(1, K):
                y = y + xw_ref[t:t + ch, :] * wdw[t:t + 1, :]
        else:
            # Window fully inside the body block: slide directly on it.
            y = xb_ref[0, r0:r0 + ch, :] * wdw[0:1, :]
            for t in range(1, K):
                y = y + xb_ref[0, r0 + t:r0 + t + ch, :] * wdw[t:t + 1, :]
        if use_bf16:
            y = y.astype(jnp.bfloat16)
        # Pointwise 1x1 conv = (ch, Cin_p) @ (Cin_p, Cout_p) on the MXU,
        # f32 accumulation; fused bias + optional ReLU on the VPU.
        z = jnp.dot(y, wpw, preferred_element_type=jnp.float32)
        z = z + bpw
        if relu:
            z = jnp.maximum(z, 0.0)
        o_ref[0, r0:r0 + ch, :] = z.astype(o_ref.dtype)


def depthwise_separable_conv(x, w_dw, b_dw, w_pw, b_pw, *, k, relu=True,
                             tile_l=512, use_bf16_matmul=False):
    """x: (N, L, C_in) -> (N, L_out, C_out).

    w_dw: (k, C_in)       depthwise weights (PyTorch (C_in, 1, k) transposed)
    b_dw: (1, C_in)
    w_pw: (C_in, C_out)   pointwise weights (PyTorch (C_out, C_in, 1) transposed)
    b_pw: (1, C_out)
    """
    N, L, Cin = x.shape
    K = int(k)
    Cout = w_pw.shape[1]
    pad = K // 2
    L_out = L + 2 * pad - K + 1              # == L for odd k (PyTorch conv)

    LANES = 128
    Cin_p = _round_up(Cin, LANES)
    Cout_p = _round_up(Cout, LANES)

    HB = _round_up(max(K - 1, 1), 8)         # halo rows, sublane aligned
    TL = min(int(tile_l), _round_up(L_out, 8))
    TL = _round_up(TL, HB)                   # halo block index must be exact
    CH = min(128, TL)                        # sub-chunk rows (vreg pressure)
    nT = _round_up(L_out, TL) // TL
    L_out_p = nT * TL
    Lpp = L_out_p + HB                       # padded input length

    # Static scratch sizing: only chunks whose FIR window crosses the tile
    # boundary use the scratch (rows = body tail + halo).
    scratch_rows = 8
    for r0 in range(0, TL, CH):
        ch = min(CH, TL - r0)
        if r0 + ch + K - 1 > TL:
            scratch_rows = max(scratch_rows, TL - r0 + HB)

    # Single fused pad: left halo zeros + right (halo + round-to-tile) zeros
    # + channel pad to a full 128-lane width.
    xp = jnp.pad(x, ((0, 0), (pad, Lpp - pad - L), (0, Cin_p - Cin)))

    w_dw_p = jnp.pad(w_dw, ((0, 0), (0, Cin_p - Cin)))
    w_pw_p = jnp.pad(w_pw, ((0, Cin_p - Cin), (0, Cout_p - Cout)))
    # Fold the depthwise bias into the pointwise bias (exact in exact math):
    #   (y + b_dw) @ W + b_pw == y @ W + (b_dw @ W + b_pw)
    b_eff = b_pw + jnp.dot(b_dw, w_pw)
    b_eff_p = jnp.pad(b_eff, ((0, 0), (0, Cout_p - Cout)))

    kernel = functools.partial(_dsconv_kernel, TL=TL, CH=CH, HB=HB, K=K,
                               relu=relu, use_bf16=use_bf16_matmul)

    halo_blocks_per_tile = TL // HB          # static; HB divides TL

    out_p = pl.pallas_call(
        kernel,
        out_shape=jax.ShapeDtypeStruct((N, L_out_p, Cout_p), x.dtype),
        grid_spec=pltpu.PrefetchScalarGridSpec(
            num_scalar_prefetch=0,
            grid=(N, nT),
            in_specs=[
                # body rows of the current L tile
                pl.BlockSpec((1, TL, Cin_p), lambda n, l: (n, l, 0)),
                # right halo: first HB rows after the tile (same array again)
                pl.BlockSpec((1, HB, Cin_p),
                             lambda n, l: (n, (l + 1) * halo_blocks_per_tile, 0)),
                pl.BlockSpec((K, Cin_p), lambda n, l: (0, 0)),
                pl.BlockSpec((Cin_p, Cout_p), lambda n, l: (0, 0)),
                pl.BlockSpec((1, Cout_p), lambda n, l: (0, 0)),
            ],
            out_specs=pl.BlockSpec((1, TL, Cout_p), lambda n, l: (n, l, 0)),
            scratch_shapes=[pltpu.VMEM((scratch_rows, Cin_p), x.dtype)],
        ),
        compiler_params=pltpu.CompilerParams(
            dimension_semantics=("parallel", "parallel")),
    )(xp, xp, w_dw_p, w_pw_p, b_eff_p)

    # Strip L / channel padding (no-op when L_out, Cout are already aligned).
    return out_p[:, :L_out, :Cout]


def _reference(x, w_dw, b_dw, w_pw, b_pw, *, k, relu=True):
    """Pure-JAX reference mirroring the PyTorch module semantics."""
    N, L, Cin = x.shape
    xt = jnp.transpose(x, (0, 2, 1))                      # (N, Cin, L)
    dw = jnp.transpose(w_dw, (1, 0))[:, None, :]          # (Cin, 1, k)
    y = jax.lax.conv_general_dilated(
        xt, dw, window_strides=(1,), padding=[(k // 2, k // 2)],
        feature_group_count=Cin,
        dimension_numbers=("NCH", "OIH", "NCH"))
    y = y + b_dw.reshape(1, Cin, 1)
    pw = jnp.transpose(w_pw, (1, 0))[:, :, None]          # (Cout, Cin, 1)
    z = jax.lax.conv_general_dilated(
        y, pw, window_strides=(1,), padding=[(0, 0)],
        dimension_numbers=("NCH", "OIH", "NCH"))
    z = z + b_pw.reshape(1, -1, 1)
    if relu:
        z = jnp.maximum(z, 0.0)
    return jnp.transpose(z, (0, 2, 1))                    # (N, L_out, Cout)


def _make_params(key, K, Cin, Cout):
    k1, k2, k3, k4 = jax.random.split(key, 4)
    # Deterministic PyTorch-style 1/sqrt(fan_in) uniform init.
    dw_bound = 1.0 / np.sqrt(1 * K)      # depthwise fan_in = (in_ch/groups)*k
    pw_bound = 1.0 / np.sqrt(Cin * 1)    # pointwise fan_in = in_ch
    w_dw = jax.random.uniform(k1, (K, Cin), jnp.float32, -dw_bound, dw_bound)
    b_dw = jax.random.uniform(k2, (1, Cin), jnp.float32, -dw_bound, dw_bound)
    w_pw = jax.random.uniform(k3, (Cin, Cout), jnp.float32, -pw_bound, pw_bound)
    b_pw = jax.random.uniform(k4, (1, Cout), jnp.float32, -pw_bound, pw_bound)
    return w_dw, b_dw, w_pw, b_pw


if __name__ == "__main__":
    key = jax.random.PRNGKey(0)

    # Case 1: DepthwiseSeparableConv(in_ch=32, out_ch=64, k=5, dim=1)
    N, L, Cin, Cout, K = 2, 16, 32, 64, 5
    kx, kp = jax.random.split(key)
    x = jax.random.normal(kx, (N, L, Cin), dtype=jnp.float32)
    w_dw, b_dw, w_pw, b_pw = _make_params(kp, K, Cin, Cout)
    out = depthwise_separable_conv(x, w_dw, b_dw, w_pw, b_pw, k=K, relu=True)
    out = jax.block_until_ready(out)
    ref = _reference(x, w_dw, b_dw, w_pw, b_pw, k=K, relu=True)
    np.testing.assert_allclose(np.asarray(out), np.asarray(ref),
                               rtol=1e-5, atol=1e-5)

    # Case 2: multi-tile sequence, ragged channels, k=7 (exercises halo path
    # across tiles and L/channel padding strip).
    N2, L2, Cin2, Cout2, K2 = 2, 40, 48, 40, 7
    kx2, kp2 = jax.random.split(jax.random.fold_in(key, 1))
    x2 = jax.random.normal(kx2, (N2, L2, Cin2), dtype=jnp.float32)
    w_dw2, b_dw2, w_pw2, b_pw2 = _make_params(kp2, K2, Cin2, Cout2)
    out2 = depthwise_separable_conv(x2, w_dw2, b_dw2, w_pw2, b_pw2, k=K2,
                                    relu=True, tile_l=16)
    out2 = jax.block_until_ready(out2)
    ref2 = _reference(x2, w_dw2, b_dw2, w_pw2, b_pw2, k=K2, relu=True)
    np.testing.assert_allclose(np.asarray(out2), np.asarray(ref2),
                               rtol=1e-5, atol=1e-5)

    print("KERNEL_OK")
</pallas_src>

<mosaic_0001>
module attributes {stable_mosaic.version = 11 : i64} {
  func.func @_dsconv_kernel(%arg0: i32, %arg1: i32, %arg2: memref<1x16x128xf32, #tpu.memory_space<vmem>>, %arg3: memref<1x8x128xf32, #tpu.memory_space<vmem>>, %arg4: memref<5x128xf32, #tpu.memory_space<vmem>>, %arg5: memref<128x128xf32, #tpu.memory_space<vmem>>, %arg6: memref<1x128xf32, #tpu.memory_space<vmem>>, %arg7: memref<1x16x128xf32, #tpu.memory_space<vmem>>, %arg8: memref<24x128xf32, #tpu.memory_space<vmem>>) attributes {dimension_semantics = [#tpu.dimension_semantics<parallel>, #tpu.dimension_semantics<parallel>], iteration_bounds = array<i64: 2, 1>, scalar_prefetch = 0 : i64, scratch_operands = 1 : i64, tpu.core_type = #tpu.core_type<tc>, window_params = [{transform_indices = @transform_0, window_bounds = array<i64: 1, 16, 128>}, {transform_indices = @transform_1, window_bounds = array<i64: 1, 8, 128>}, {pipeline_mode = #tpu.pipeline_mode<synchronous>, transform_indices = @transform_2, window_bounds = array<i64: 5, 128>}, {pipeline_mode = #tpu.pipeline_mode<synchronous>, transform_indices = @transform_3, window_bounds = array<i64: 128, 128>}, {pipeline_mode = #tpu.pipeline_mode<synchronous>, transform_indices = @transform_4, window_bounds = array<i64: 1, 128>}, {transform_indices = @transform_5, window_bounds = array<i64: 1, 16, 128>}]} {
    %c0 = arith.constant 0 : index
    %c0_0 = arith.constant 0 : index
    %0 = vector.load %arg4[%c0, %c0_0] : memref<5x128xf32, #tpu.memory_space<vmem>>, vector<5x128xf32>
    %c0_1 = arith.constant 0 : index
    %c0_2 = arith.constant 0 : index
    %1 = vector.load %arg5[%c0_1, %c0_2] : memref<128x128xf32, #tpu.memory_space<vmem>>, vector<128x128xf32>
    %c0_3 = arith.constant 0 : index
    %c0_4 = arith.constant 0 : index
    %2 = vector.load %arg6[%c0_3, %c0_4] : memref<1x128xf32, #tpu.memory_space<vmem>>, vector<1x128xf32>
    %c0_5 = arith.constant 0 : index
    %c0_6 = arith.constant 0 : index
    %c0_7 = arith.constant 0 : index
    %3 = vector.load %arg2[%c0_5, %c0_6, %c0_7] : memref<1x16x128xf32, #tpu.memory_space<vmem>>, vector<1x16x128xf32>
    %4 = vector.shape_cast %3 : vector<1x16x128xf32> to vector<16x128xf32>
    %c0_8 = arith.constant 0 : index
    %c0_9 = arith.constant 0 : index
    %5 = vector.load %arg8[%c0_8, %c0_9] : memref<24x128xf32, #tpu.memory_space<vmem>>, vector<16x128xf32>
    tpu.vector_store %arg8[%c0_8, %c0_9], %4 {strides = array<i32>} : memref<24x128xf32, #tpu.memory_space<vmem>>, vector<16x128xf32>,
    %c0_10 = arith.constant 0 : index
    %c0_11 = arith.constant 0 : index
    %c0_12 = arith.constant 0 : index
    %6 = vector.load %arg3[%c0_10, %c0_11, %c0_12] : memref<1x8x128xf32, #tpu.memory_space<vmem>>, vector<1x8x128xf32>
    %7 = vector.shape_cast %6 : vector<1x8x128xf32> to vector<8x128xf32>
    %c16 = arith.constant 16 : index
    %c0_13 = arith.constant 0 : index
    %8 = vector.load %arg8[%c16, %c0_13] : memref<24x128xf32, #tpu.memory_space<vmem>>, vector<8x128xf32>
    tpu.vector_store %arg8[%c16, %c0_13], %7 {strides = array<i32>} : memref<24x128xf32, #tpu.memory_space<vmem>>, vector<8x128xf32>,
    %c0_14 = arith.constant 0 : index
    %c0_15 = arith.constant 0 : index
    %9 = vector.load %arg8[%c0_14, %c0_15] : memref<24x128xf32, #tpu.memory_space<vmem>>, vector<16x128xf32>
    %10 = vector.extract_strided_slice %0 {offsets = [0, 0], sizes = [1, 128], strides = [1, 1]} : vector<5x128xf32> to vector<1x128xf32>
    %11 = vector.broadcast %10 : vector<1x128xf32> to vector<16x128xf32>
    %12 = arith.mulf %9, %11 : vector<16x128xf32>
    %c1 = arith.constant 1 : index
    %c0_16 = arith.constant 0 : index
    %13 = vector.load %arg8[%c1, %c0_16] : memref<24x128xf32, #tpu.memory_space<vmem>>, vector<16x128xf32>
    %14 = vector.extract_strided_slice %0 {offsets = [1, 0], sizes = [1, 128], strides = [1, 1]} : vector<5x128xf32> to vector<1x128xf32>
    %15 = vector.broadcast %14 : vector<1x128xf32> to vector<16x128xf32>
    %16 = arith.mulf %13, %15 : vector<16x128xf32>
    %17 = arith.addf %12, %16 : vector<16x128xf32>
    %c2 = arith.constant 2 : index
    %c0_17 = arith.constant 0 : index
    %18 = vector.load %arg8[%c2, %c0_17] : memref<24x128xf32, #tpu.memory_space<vmem>>, vector<16x128xf32>
    %19 = vector.extract_strided_slice %0 {offsets = [2, 0], sizes = [1, 128], strides = [1, 1]} : vector<5x128xf32> to vector<1x128xf32>
    %20 = vector.broadcast %19 : vector<1x128xf32> to vector<16x128xf32>
    %21 = arith.mulf %18, %20 : vector<16x128xf32>
    %22 = arith.addf %17, %21 : vector<16x128xf32>
    %c3 = arith.constant 3 : index
    %c0_18 = arith.constant 0 : index
    %23 = vector.load %arg8[%c3, %c0_18] : memref<24x128xf32, #tpu.memory_space<vmem>>, vector<16x128xf32>
    %24 = vector.extract_strided_slice %0 {offsets = [3, 0], sizes = [1, 128], strides = [1, 1]} : vector<5x128xf32> to vector<1x128xf32>
    %25 = vector.broadcast %24 : vector<1x128xf32> to vector<16x128xf32>
    %26 = arith.mulf %23, %25 : vector<16x128xf32>
    %27 = arith.addf %22, %26 : vector<16x128xf32>
    %c4 = arith.constant 4 : index
    %c0_19 = arith.constant 0 : index
    %28 = vector.load %arg8[%c4, %c0_19] : memref<24x128xf32, #tpu.memory_space<vmem>>, vector<16x128xf32>
    %29 = vector.extract_strided_slice %0 {offsets = [4, 0], sizes = [1, 128], strides = [1, 1]} : vector<5x128xf32> to vector<1x128xf32>
    %30 = vector.broadcast %29 : vector<1x128xf32> to vector<16x128xf32>
    %31 = arith.mulf %28, %30 : vector<16x128xf32>
    %32 = arith.addf %27, %31 : vector<16x128xf32>
    %cst = arith.constant dense<0.000000e+00> : vector<16x128xf32>
    %33 = tpu.matmul %32, %1, %cst {dimension_numbers = #tpu.dot_dimension_numbers<[1], [0], [0], [1], [0, 0, 1, 1], [], []>} : vector<16x128xf32>, vector<128x128xf32>, vector<16x128xf32> -> vector<16x128xf32>
    %34 = vector.broadcast %2 : vector<1x128xf32> to vector<16x128xf32>
    %35 = arith.addf %33, %34 : vector<16x128xf32>
    %cst_20 = arith.constant 0.000000e+00 : f32
    %36 = vector.broadcast %cst_20 : f32 to vector<16x128xf32>
    %37 = arith.maximumf %35, %36 : vector<16x128xf32>
    %c0_21 = arith.constant 0 : index
    %c0_22 = arith.constant 0 : index
    %c0_23 = arith.constant 0 : index
    %38 = vector.load %arg7[%c0_21, %c0_22, %c0_23] : memref<1x16x128xf32, #tpu.memory_space<vmem>>, vector<1x16x128xf32>
    %39 = vector.shape_cast %38 : vector<1x16x128xf32> to vector<16x128xf32>
    %40 = vector.shape_cast %37 : vector<16x128xf32> to vector<1x16x128xf32>
    tpu.vector_store %arg7[%c0_21, %c0_22, %c0_23], %40 {strides = array<i32>} : memref<1x16x128xf32, #tpu.memory_space<vmem>>, vector<1x16x128xf32>,
    return
  }
  func.func @transform_0(%arg0: i32, %arg1: i32) -> (i32, i32, i32) {
    %c0_i32 = arith.constant 0 : i32
    %c0_i32_0 = arith.constant 0 : i32
    return %arg0, %arg1, %c0_i32 : i32, i32, i32
  }
  func.func @transform_1(%arg0: i32, %arg1: i32) -> (i32, i32, i32) {
    %c1_i32 = arith.constant 1 : i32
    %0 = arith.addi %arg1, %c1_i32 : i32
    %c2_i32 = arith.constant 2 : i32
    %1 = arith.muli %0, %c2_i32 : i32
    %c0_i32 = arith.constant 0 : i32
    %c0_i32_0 = arith.constant 0 : i32
    return %arg0, %1, %c0_i32 : i32, i32, i32
  }
  func.func @transform_2(%arg0: i32, %arg1: i32) -> (i32, i32) {
    %c0_i32 = arith.constant 0 : i32
    %c0_i32_0 = arith.constant 0 : i32
    %c0_i32_1 = arith.constant 0 : i32
    return %c0_i32, %c0_i32_0 : i32, i32
  }
  func.func @transform_3(%arg0: i32, %arg1: i32) -> (i32, i32) {
    %c0_i32 = arith.constant 0 : i32
    %c0_i32_0 = arith.constant 0 : i32
    %c0_i32_1 = arith.constant 0 : i32
    return %c0_i32, %c0_i32_0 : i32, i32
  }
  func.func @transform_4(%arg0: i32, %arg1: i32) -> (i32, i32) {
    %c0_i32 = arith.constant 0 : i32
    %c0_i32_0 = arith.constant 0 : i32
    %c0_i32_1 = arith.constant 0 : i32
    return %c0_i32, %c0_i32_0 : i32, i32
  }
  func.func @transform_5(%arg0: i32, %arg1: i32) -> (i32, i32, i32) {
    %c0_i32 = arith.constant 0 : i32
    %c0_i32_0 = arith.constant 0 : i32
    return %arg0, %arg1, %c0_i32 : i32, i32, i32
  }
}

</mosaic_0001>

<bundles_post_ra>
// kernel: tpu_custom_call.1
= control target key start
LH: loop header
LB: loop body
LE: loop exit
PB: predicated region body
PF: predicated region fallthrough
CT: control target
= control target key end

     0   :  { %s1423_s0 = inlined_call_operand.hbm [shape: f32[2,24,128], index: 0, kind: input, shape index: {}]   ;;  %s1424_s1 = inlined_call_operand.hbm [shape: f32[2,24,128], index: 1, kind: input, shape index: {}]   ;;  %s1425_s2 = inlined_call_operand.hbm [shape: f32[5,128], index: 2, kind: input, shape index: {}]   ;;  %s1426_s3 = inlined_call_operand.hbm [shape: f32[128,128], index: 3, kind: input, shape index: {}]   ;;  %s1427_s4 = inlined_call_operand.vmem [shape: f32[1,128], index: 4, kind: input, shape index: {}]   ;;  %s1428_s5 = inlined_call_operand.hbm [shape: f32[2,16,128], index: 5, kind: output, shape index: {}]  }
   0x1   :  { %1440 = sst [smem:[#allocation20_spill]] %s1423_s0 }
   0x2   :  { %1441 = sst [smem:[#allocation21_spill]] %s1425_s2 }
   0x3   :  { %1442 = sst [smem:[#allocation22_spill]] %s1426_s3 }
   0x4   :  { %10 = vsyncpa [#allocation4], 0 }
   0x5   :  { %12 = vsyncpa [#allocation4 + $0x1], 0 }
   0x6   :  { %13 = vsyncpa [#allocation7], 0 }
   0x7   :  { %15 = vsyncpa [#allocation7 + $0x1], 0 }
   0x8   :  { %16 = vsyncpa [#allocation10], 0 }
   0x9   :  { %17 = vsyncpa [#allocation5], 0 }
   0xa   :  { %19 = vsyncpa [#allocation5 + $0x1], 0  ;;  %s1108_s18 = smov 0   ;;  %s1110_s19 = smov 0  }
   0xb   :  { %s1112_s20 = smov 0   ;;  %s1114_s21 = smov 0  }
   0xc   :  { %s1116_s22 = smov 0   ;;  %s1118_s23 = smov 0  }
   0xd LB: > { %1443 = sst [smem:[#allocation17_spill]] %s1047_s18  ;;  %s1139_s24 = sadd.s32 4294967295, %s1067_s23   ;;  %s1067_s23 = sphi %s1118_s23, %s25_s23   ;;  %s1063_s22 = sphi %s1116_s22, %s1479_s22   ;;  %s1059_s21 = sphi %s1114_s21, %s1478_s21   ;;  %s1055_s20 = sphi %s1112_s20, %s1477_s20   ;;  %s1051_s19 = sphi %s1110_s19, %s1476_s19   ;;  %s1047_s18 = sphi %s1108_s18, %s1475_s18  }
   0xe   : > { %s656_s25 = sadd.s32 4294967294, %s1067_s23   ;;  %p53_p0 = scmp.ne.s32.totalorder %s1055_s20, %s1051_s19 }
   0xf   : > { %p54_p1 = scmp.eq.s32.totalorder %s1067_s23, 0  ;;  %p59_p2 = scmp.ne.s32.totalorder %s1051_s19, %s1047_s18 }
  0x10   : > { %p1429_p3 = scmp.eq.s32.totalorder %s1139_s24, 0  ;;  %p180_p4 = scmp.eq.s32.totalorder %s1139_s24, 1 }
  0x11   : > { %p1150_p5 = por %p54_p1, %p53_p0  ;;  %p186_p6 = scmp.eq.s32.totalorder %s656_s25, 1 }
  0x12   : > { %p1156_p7 = por %p1429_p3, %p59_p2  ;;  %p1160_p8 = por %p180_p4, %p53_p0 }
  0x13   : > { %p1164_p9 = por %p186_p6, %p59_p2  ;;  %p657_p10 = scmp.ge.s32.totalorder %s1067_s23, 1 }
  0x14   : > { %s1445_s28 = scalar_select %p1156_p7, 1, 0 }
  0x15   : > { %s1446_s29 = scalar_select %p1160_p8, 1, 0 }
  0x16   : > { %s1447_s30 = scalar_select %p1164_p9, 1, 0 }
  0x17   : > { %p193_p11 = scmp.lt.s32.totalorder %s1067_s23, 3  ;;  %s1069_s7 = smov [#allocation8]  }
  0x18   : > { %1448 = sst [smem:[#allocation18_spill]] %s1447_s30  ;;  %s206_s8 = sshll.u32 %s1069_s7, 4  ;;  %s207_s8 = int_to_ptr.vmem [resolvable:$true] %s206_s8 }
  0x19   : > { %p1171_p13 = pnand %p657_p10, %p193_p11  ;;  %p798_p1 = scmp.lt.s32.totalorder %s1067_s23, 2 }
  0x1a   : > { %s1070_s10 = smov [#allocation9]   ;;  %s1452_s2 = sld [smem:[#allocation21_spill]] }
  0x1b   : > { %s1449_s6 = scalar_select %p1171_p13, 1, 0 }
  0x1c   : > { %p778_p0 = pneg %p1171_p13  ;;  %p1180_p4 = pnand %p798_p1, %p1150_p5 }
  0x1d   : > { %s216_s11 = sshll.u32 %s1070_s10, 4  ;;  %s1190_s11 = int_to_ptr.vmem [resolvable:$true] %s216_s11 }
  0x1e   : > { %s1450_s9 = scalar_select %p1180_p4, 1, 0 }
  0x1f   : > { %p1186_p2 = pnand %p778_p0, %p1429_p3 }
  0x20   : > { %s856_s15 = scalar_lea.hbm %s1452_s2, 128 }
  0x21   : > { %p857_p5 = scmp.ne.s32.totalorder %s1452_s2, %s856_s15  ;;  %p858_p6 = pneg %p1186_p2 }
  0x22   : > { %p863_p1 = scmp.lt.u32.totalorder %s856_s15, %s1452_s2 }
  0x23   : > { %p859_p10 = pnand %p858_p6, %p857_p5 }
  0x25   : > { %p860_p11 = pneg %p859_p10 }
  0x27   : > { %p865_p0 = pnand %p863_p1, %p860_p11 }
  0x29   : > { %868 = shalt.err (!%p865_p0)
}
  0x2a   : > { %s869_s7 = scalar_lea.vmem %s207_s8, 128  ;;  %p877_p8 = scmp.lt.s32.totalorder %s207_s8, %s207_s8 }
  0x2b   : > { %p870_p12 = scmp.ne.s32.totalorder %s207_s8, %s869_s7  ;;  %p878_p7 = scmp.lt.s32.totalorder %s869_s7, %s869_s7 }
  0x2d   : > { %p872_p3 = pnand %p870_p12, %p858_p6  ;;  %p879_p13 = por %p878_p7, %p877_p8 }
  0x2f   : > { %p873_p9 = pneg %p872_p3 }
  0x31   : > { %p880_p4 = pnand %p879_p13, %p873_p9 }
  0x33   : > { %883 = shalt.err (!%p880_p4)
}
  0x34   : > { %781 = dma.hbm_to_vmem [thread:$0]  (!%p1186_p2), %s1452_s2, 128, %s207_s8, [#allocation7]  }
  0x35   : > { %s1453_s3 = sld [smem:[#allocation22_spill]] }
  0x3b   : > { %s884_s16 = scalar_lea.hbm %s1453_s3, 2048 }
  0x3c   : > { %p885_p3 = scmp.ne.s32.totalorder %s1453_s3, %s884_s16  ;;  %p891_p9 = scmp.lt.u32.totalorder %s884_s16, %s1453_s3 }
  0x3e   : > { %p887_p7 = pnand %p885_p3, %p858_p6 }
  0x40   : > { %p888_p8 = pneg %p887_p7 }
  0x42   : > { %p893_p12 = pnand %p891_p9, %p888_p8 }
  0x44   : > { %896 = shalt.err (!%p893_p12)
}
  0x45   : > { %s897_s8 = scalar_lea.vmem %s1190_s11, 2048  ;;  %p905_p10 = scmp.lt.s32.totalorder %s1190_s11, %s1190_s11 }
  0x46   : > { %p898_p13 = scmp.ne.s32.totalorder %s1190_s11, %s897_s8  ;;  %p906_p11 = scmp.lt.s32.totalorder %s897_s8, %s897_s8 }
  0x48   : > { %p900_p4 = pnand %p898_p13, %p858_p6  ;;  %p907_p1 = por %p906_p11, %p905_p10 }
  0x4a   : > { %p901_p5 = pneg %p900_p4 }
  0x4c   : > { %p908_p0 = pnand %p907_p1, %p901_p5 }
  0x4e   : > { %911 = shalt.err (!%p908_p0)
}
  0x4f   : > { %s1434_s10 = smov 128   ;;  %s1436_s13 = smov 8  }
  0x50   : > { %784 = dma.hbm_to_vmem [thread:$0]  (!%p1186_p2), %s1453_s3, 2048, %s1190_s11, [#allocation10], %s1434_s10, %s1434_s10, %s1436_s13  }
  0x51   : > { %s1243_s16 = sand.u32 1, %s1055_s20   ;;  %s37_s17 = sadd.s32 1, %s1063_s22 }
  0x52   : > { %s661_s25 = sshll.u32 %s1243_s16, 4  ;;  %p39_p6 = scmp.ge.s32.totalorder %s37_s17, 2 }
  0x53   : > { %s1435_s27 = smul.u32 384, %s1063_s22  ;;  %s237_s7 = scalar_lea.vmem [#allocation3], %s661_s25 }
  0x54   : > { %s252_s8 = sshll.u32 %s237_s7, 4  ;;  %s1481_s17 = smov (%p39_p6, %s37_s17), 0  ;;  %s1257_s8 = int_to_ptr.vmem [resolvable:$true] %s252_s8 }
  0x55   : > { %1454 = sst [smem:[#allocation19_spill]] %s1481_s17  ;;  %s1455_s0 = sld [smem:[#allocation20_spill]] }
  0x56   : > { %s41_s14 = ssub.s32 %s1063_s22, %s1481_s17  ;;  %s234_s7 = scalar_lea.sflag [#allocation4], %s1243_s16 }
  0x57   : > { %p1262_p2 = scmp.eq.s32.totalorder %s41_s14, 0  ;;  %p1457_p7 = scmp.ne.s32.totalorder %s1450_s9, 0 }
  0x59   : > { %p914_p8 = pneg %p1457_p7 }
  0x5b   : > { %s1255_s11 = scalar_lea.hbm %s1455_s0, %s1435_s27  ;;  %s917_s27 = scalar_lea.hbm %s1455_s0, 768 }
  0x5c   : > { %s912_s10 = scalar_lea.hbm %s1255_s11, 256  ;;  %p918_p13 = scmp.lt.u32.totalorder %s1255_s11, %s1455_s0 }
  0x5d   : > { %p913_p3 = scmp.ne.s32.totalorder %s1255_s11, %s912_s10  ;;  %p919_p4 = scmp.lt.u32.totalorder %s917_s27, %s912_s10 }
  0x5e   : > { %p921_p10 = scmp.lt.u32.totalorder %s912_s10, %s1255_s11 }
  0x5f   : > { %p915_p9 = pnand %p914_p8, %p913_p3  ;;  %p920_p5 = por %p919_p4, %p918_p13 }
  0x61   : > { %p916_p12 = pneg %p915_p9  ;;  %p922_p11 = por %p921_p10, %p920_p5 }
  0x63   : > { %p923_p1 = pnand %p922_p11, %p916_p12 }
  0x65   : > { %926 = shalt.err (!%p923_p1)
}
  0x66   : > { %s927_s14 = scalar_lea.vmem %s1257_s8, 256  ;;  %s1073_s26 = smov [#allocation3]  }
  0x67   : > { %p928_p0 = scmp.ne.s32.totalorder %s1257_s8, %s927_s14  ;;  %s932_s12 = sshll.u32 %s1073_s26, 4  ;;  %s933_s12 = int_to_ptr.vmem [resolvable:$false] %s932_s12 }
  0x68   : > { %s934_s2 = scalar_lea.vmem %s933_s12, 512  ;;  %p935_p9 = scmp.lt.s32.totalorder %s1257_s8, %s933_s12 }
  0x69   : > { %p930_p6 = pnand %p928_p0, %p914_p8  ;;  %p936_p13 = scmp.lt.s32.totalorder %s934_s2, %s927_s14 }
  0x6b   : > { %p931_p3 = pneg %p930_p6  ;;  %p937_p4 = por %p936_p13, %p935_p9 }
  0x6d   : > { %p938_p5 = pnand %p937_p4, %p931_p3 }
  0x6f   : > { %941 = shalt.err (!%p938_p5)
}
  0x70   : > { %s1458_s10 = smov 8   ;;  %s1459_s13 = smov 128  }
  0x71   : > { %788 = dma.hbm_to_vmem [thread:$0]  (!%p1457_p7), %s1255_s11, 256, %s1257_s8, %s234_s7, %s1459_s13, %s1459_s13, %s1458_s10  }
  0x72   : > { %s1460_s27 = sadd.s32 1, %s1055_s20  ;;  %s663_s26 = sshll.u32 %s1243_s16, 3 }
  0x73   : > { %s1302_s14 = scalar_select %p1262_p2, %s1055_s20, %s1460_s27  }
  0x74   : > { %s1461_s12 = smul.u32 384, %s1063_s22  ;;  %s266_s17 = scalar_lea.vmem [#allocation6], %s663_s26 }
  0x75   : > { %s277_s30 = sshll.u32 %s266_s17, 4  ;;  %s1462_s18 = sand.u32 1, %s1067_s23   ;;  %s278_s30 = int_to_ptr.vmem [resolvable:$true] %s277_s30 }
  0x76   : > { %s568_s0 = scalar_lea.hbm %s1424_s1, %s1461_s12  ;;  %s263_s8 = scalar_lea.sflag [#allocation7], %s1462_s18 }
  0x77   : > { %s1310_s3 = scalar_lea.hbm %s568_s0, 256  ;;  %s972_s11 = scalar_lea.hbm %s568_s0, 384 }
  0x78   : > { %p943_p12 = scmp.ne.s32.totalorder %s1310_s3, %s972_s11  ;;  %s947_s15 = scalar_lea.hbm %s1424_s1, 768 }
  0x79   : > { %p948_p11 = scmp.lt.u32.totalorder %s1310_s3, %s1424_s1  ;;  %p949_p1 = scmp.lt.u32.totalorder %s947_s15, %s972_s11 }
  0x7a   : > { %p945_p2 = pnand %p943_p12, %p914_p8  ;;  %p951_p6 = scmp.lt.u32.totalorder %s972_s11, %s1310_s3 }
  0x7b   : > { %p950_p0 = por %p949_p1, %p948_p11 }
  0x7c   : > { %p946_p10 = pneg %p945_p2 }
  0x7d   : > { %p952_p3 = por %p951_p6, %p950_p0 }
  0x7f   : > { %p953_p9 = pnand %p952_p3, %p946_p10 }
  0x81   : > { %956 = shalt.err (!%p953_p9)
}
  0x82   : > { %s957_s0 = scalar_lea.vmem %s278_s30, 128  ;;  %s1074_s18 = smov [#allocation6]  }
  0x83   : > { %p958_p13 = scmp.ne.s32.totalorder %s278_s30, %s957_s0  ;;  %s962_s17 = sshll.u32 %s1074_s18, 4  ;;  %s963_s17 = int_to_ptr.vmem [resolvable:$false] %s962_s17 }
  0x84   : > { %s964_s13 = scalar_lea.vmem %s963_s17, 256  ;;  %p965_p12 = scmp.lt.s32.totalorder %s278_s30, %s963_s17 }
  0x85   : > { %p960_p4 = pnand %p958_p13, %p914_p8  ;;  %p966_p2 = scmp.lt.s32.totalorder %s964_s13, %s957_s0 }
  0x87   : > { %p961_p5 = pneg %p960_p4  ;;  %p967_p1 = por %p966_p2, %p965_p12 }
  0x89   : > { %p968_p11 = pnand %p967_p1, %p961_p5 }
  0x8b   : > { %971 = shalt.err (!%p968_p11)
}
  0x8c   : > { %791 = dma.hbm_to_vmem [thread:$0]  (!%p1457_p7), %s1310_s3, 128, %s278_s30, %s263_s8  }
  0x8d   : > { %p1463_p10 = scmp.ne.s32.totalorder %s1449_s6, 0 }
  0x8e   : > { %s1335_s27 = sand.u32 (!%p1463_p10), 1, %s1051_s19   ;;  %p1464_p8 = scmp.ne.s32.totalorder (!%p1463_p10), %s1445_s28, 0 }
  0x8f   : > { %286 = sbr.rel (%p1463_p10) target bundleno = 428 (0x1ac), region = 40  ;;  %s666_s26 = sshll.u32 (!%p1463_p10), %s1335_s27, 4 }
  0x90   : > { %s289_s12 = scalar_lea.sflag (!%p1463_p10), [#allocation4], %s1335_s27  ;;  %s1341_s2 = scalar_lea.vmem (!%p1463_p10), [#allocation3], %s666_s26 }
  0x96   : > { %1026 = dma.done.wait (%p1464_p8), %s289_s12, 256  }
  0x97   : > { %1028 = vsyncadd (%p1464_p8), %s289_s12, 4294967040  ;;  %s297_s3 = sand.u32 1, %s1139_s24   ;;  %s667_s30 = sshll.u32 %s1335_s27, 3 }
  0x98   : > { %s298_s6 = scalar_lea.sflag [#allocation7], %s297_s3  ;;  %s301_s9 = scalar_lea.vmem [#allocation6], %s667_s30 }
  0x99   : > { %1030 = dma.done.wait (%p1464_p8), %s298_s6, 128  }
  0x9a   : > { %1032 = vsyncadd (%p1464_p8), %s298_s6, 4294967168  ;;  %p1465_p7 = scmp.eq.s32.totalorder %s1139_s24, 0 }
  0x9c   : > { %1034 = dma.done.wait (%p1465_p7), [#allocation7], 128   ;;  %p1466_p0 = pmov %p1465_p7 }
  0x9e   : > { %1036 = vsyncadd (%p1466_p0), [#allocation7], 4294967168  ;;  %p1467_p6 = pmov %p1466_p0 }
  0x9f   : > { %p1468_p3 = pmov %p1466_p0 }
  0xa0   : > { %1038 = dma.done.wait (%p1467_p6), [#allocation10], 2048  }
  0xa1   : > { %1040 = vsyncadd (%p1468_p3), [#allocation10], 4294965248  ;;  %v375_v0 = vlaneseq  ;;  %v350_v1 = vld [vmem:[#allocation9] sm:$0xff]  ;;  %v351_v2 = vld [vmem:[#allocation9 + $0x8] sm:$0xff]  ;;  %s340_s8 = scalar_lea.vmem [#allocation11], %s666_s26  ;;  %s677_s16 = sshll.u32 %s1059_s21, 8 }
  0xa2   : > { %v352_v3 = vld [vmem:[#allocation9 + $0x10] sm:$0xff]  ;;  %v731_v4 = vpack.c.bf16 %v351_v2, %v350_v1  ;;  %v353_v5 = vld [vmem:[#allocation9 + $0x18] sm:$0xff]  ;;  %v354_v8 = vld [vmem:[#allocation9 + $0x20] sm:$0xff]  ;;  %s522_s11 = sshll.u32 %s340_s8, 4  ;;  %s1374_s7 = scalar_lea.hbm %s1428_s5, %s677_s16  ;;  %s1369_s11 = int_to_ptr.vmem [resolvable:$true] %s522_s11 }
  0xa3   : > { %v376_v6 = vshrl.u32 %v375_v0, 7  ;;  %v735_v7 = vpack.c.bf16 %v353_v5, %v352_v3  ;;  %v355_v9 = vld [vmem:[#allocation9 + $0x28] sm:$0xff]  ;;  %v356_v11 = vld [vmem:[#allocation9 + $0x30] sm:$0xff]  ;;  %v357_v12 = vld [vmem:[#allocation9 + $0x38] sm:$0xff]  ;;  %s507_s10 = scalar_lea.sflag [#allocation5], %s1335_s27  ;;  %s973_s0 = scalar_lea.vmem %s1369_s11, 256 }
  0xa4   : > { %732 = vmatprep.subr.bf16.mxu0 %v731_v4  ;;  %v739_v10 = vpack.c.bf16 %v355_v9, %v354_v8  ;;  %v367_v13 = vld [vmem:[%s1341_s2] sm:$0xff]  ;;  %v368_v16 = vld [vmem:[%s1341_s2 + $0x8] sm:$0xff]  ;;  %v743_v20 = vpack.c.bf16 %v357_v12, %v356_v11  ;;  %p974_p9 = scmp.ne.s32.totalorder %s1369_s11, %s973_s0  ;;  %p1469_p13 = scmp.ne.s32.totalorder %s1446_s29, 0 }
  0xa5   : > { %734 = vmatpush3.bf16.msra.mxu0 %v731_v4  ;;  %v377_v14 = vsub.s32 0, %v376_v6  ;;  %v349_v15 = vld [vmem:[#allocation8] sm:$0x1f]  ;;  %369 = vst [vmem:[#allocation2] sm:$0xff] %v367_v13  ;;  %v371_v17 = vld [vmem:[%s301_s9] sm:$0xff]  ;;  %370 = vst [vmem:[#allocation2 + $0x8] sm:$0xff] %v368_v16 }
  0xa6   : > { %736 = vmatprep.subr.bf16.mxu0 %v735_v7  ;;  %v385_v18 = vsub.s32 1, %v376_v6  ;;  %v395_v19 = vsub.s32 2, %v376_v6  ;;  %372 = vst [vmem:[#allocation2 + $0x10] sm:$0xff] %v371_v17  ;;  %v405_v22 = vsub.s32 3, %v376_v6  ;;  %v358_v23 = vld [vmem:[#allocation9 + $0x40] sm:$0xff]  ;;  %v359_v24 = vld [vmem:[#allocation9 + $0x48] sm:$0xff]  ;;  %p975_p4 = pnand %p974_p9, %p1469_p13 }
  0xa7   : > { %v378_v21 = vrot.slane %v349_v15, %v377_v14  ;;  %v415_v27 = vsub.s32 4, %v376_v6  ;;  %v747_v28 = vpack.c.bf16 %v359_v24, %v358_v23  ;;  %v360_v29 = vld [vmem:[#allocation9 + $0x50] sm:$0xff]  ;;  %v361_v30 = vld [vmem:[#allocation9 + $0x58] sm:$0xff]  ;;  %v362_v47 = vld [vmem:[#allocation9 + $0x60] sm:$0xff]  ;;  %s1075_s21 = smov [#allocation11]  }
  0xa8   : > { %v386_v25 = vrot.slane %v349_v15, %v385_v18  ;;  %v396_v26 = vrot.slane %v349_v15, %v395_v19  ;;  %v406_v32 = vrot.slane %v349_v15, %v405_v22  ;;  %v751_v44 = vpack.c.bf16 %v361_v30, %v360_v29  ;;  %v363_v48 = vld [vmem:[#allocation9 + $0x68] sm:$0xff]  ;;  %v364_v56 = vld [vmem:[#allocation9 + $0x70] sm:$0xff]  ;;  %v365_v57 = vld [vmem:[#allocation9 + $0x78] sm:$0xff]  ;;  %p976_p5 = pneg %p975_p4  ;;  %s977_s18 = sshll.u32 %s1075_s21, 4  ;;  %s978_s18 = int_to_ptr.vmem [resolvable:$false] %s977_s18 }
  0xa9   : > { %738 = vmatpush3.bf16.msra.mxu0 %v735_v7  ;;  %v379_v31 = vmul.f32 %v378_v21, %v367_v13  ;;  %v416_v38 = vrot.slane %v349_v15, %v415_v27  ;;  %v380_v39 = vmul.f32 %v378_v21, %v368_v16  ;;  %v755_v54 = vpack.c.bf16 %v363_v48, %v362_v47  ;;  %v671_v2 = vld [vmem:[%s1427_s4] ss:$0 sm:$0xff]  ;;  %s979_s17 = scalar_lea.vmem %s978_s18, 512  ;;  %p980_p12 = scmp.lt.s32.totalorder %s1369_s11, %s978_s18 }
  0xaa   : > { %740 = vmatprep.subr.bf16.mxu0 %v739_v10  ;;  %v759_v62 = vpack.c.bf16 %v365_v57, %v364_v56  ;;  %p981_p2 = scmp.lt.s32.totalorder %s979_s17, %s973_s0 }
  0xac   : > { %v381_v33 = vld [vmem:[#allocation2 + $0x1] sm:$0xff]  ;;  %p982_p1 = por %p981_p2, %p980_p12 }
  0xad   : > { %742 = vmatpush3.bf16.msra.mxu0 %v739_v10  ;;  %v391_v34 = vld [vmem:[#allocation2 + $0x2] sm:$0xff]  ;;  %v387_v36 = vmul.f32 %v386_v25, %v381_v33  ;;  %v392_v43 = vld [vmem:[#allocation2 + $0xa] sm:$0xff] }
  0xae   : > { %744 = vmatprep.subr.bf16.mxu0 %v743_v20  ;;  %v401_v35 = vld [vmem:[#allocation2 + $0x3] sm:$0xff]  ;;  %v397_v37 = vmul.f32 %v396_v26, %v391_v34  ;;  %v398_v52 = vmul.f32 %v396_v26, %v392_v43  ;;  %v402_v53 = vld [vmem:[#allocation2 + $0xb] sm:$0xff]  ;;  %p983_p11 = pnand %p982_p1, %p976_p5 }
  0xaf   : > { %v382_v40 = vld [vmem:[#allocation2 + $0x9] sm:$0xff]  ;;  %v389_v45 = vadd.f32 %v387_v36, %v379_v31  ;;  %v407_v46 = vmul.f32 %v406_v32, %v401_v35  ;;  %v408_v60 = vmul.f32 %v406_v32, %v402_v53 }
  0xb0   : > { %v411_v41 = vld [vmem:[#allocation2 + $0x4] sm:$0xff]  ;;  %v388_v42 = vmul.f32 %v386_v25, %v382_v40  ;;  %v412_v61 = vld [vmem:[#allocation2 + $0xc] sm:$0xff] }
  0xb1   : > { %746 = vmatpush3.bf16.msra.mxu0 %v743_v20  ;;  %v399_v49 = vadd.f32 %v397_v37, %v389_v45  ;;  %v417_v50 = vmul.f32 %v416_v38, %v411_v41  ;;  %v418_v0 = vmul.f32 %v416_v38, %v412_v61 }
  0xb2   : > { %748 = vmatprep.subr.bf16.mxu0 %v747_v28  ;;  %v390_v51 = vadd.f32 %v388_v42, %v380_v39 }
  0xb3   : > { %v409_v55 = vadd.f32 %v407_v46, %v399_v49 }
  0xb4   : > { %v400_v59 = vadd.f32 %v398_v52, %v390_v51 }
  0xb5   : > { %750 = vmatpush3.bf16.msra.mxu0 %v747_v28  ;;  %v419_v58 = vadd.f32 %v417_v50, %v409_v55 }
  0xb6   : > { %752 = vmatprep.subr.bf16.mxu0 %v751_v44  ;;  %v410_v63 = vadd.f32 %v408_v60, %v400_v59 }
  0xb7   : > { %728 = vmatprep.mubr.f32.mxu0 %v419_v58 }
  0xb8   : > { %v420_v1 = vadd.f32 %v418_v0, %v410_v63 }
  0xb9   : > { %754 = vmatpush3.bf16.msra.mxu0 %v751_v44 }
  0xba   : > { %756 = vmatprep.subr.bf16.mxu0 %v755_v54 }
  0xbd   : > { %758 = vmatpush3.bf16.msra.mxu0 %v755_v54 }
  0xbe   : > { %760 = vmatprep.subr.bf16.mxu0 %v759_v62 }
  0xc1   : > { %762 = vmatpush3.bf16.msra.mxu0 %v759_v62 }
  0xc4   : > { %729 = vmatmul.mubr.f32.vlgmr.msra.gmra.mrb[0].mxu0 %v420_v1 }
 0x197   : > { %v730_v3 = vpop.f32.mrb[0].mxu0 }
 0x198   : > { %v499_v4 = vadd.f32 %v730_v3, %v671_v2  ;;  %v493_v5 = vpop.f32.mrb[1].mxu0 }
 0x199   : > { %v494_v6 = vadd.f32 %v671_v2, %v493_v5 }
 0x19a   : > { %v503_v7 = vmax.f32 %v499_v4, 0.0 }
 0x19b   : > { %v502_v8 = vmax.f32 %v494_v6, 0.0 }
 0x19c   : > { %505 = vst [vmem:[%s340_s8 + $0x8] sm:$0xff] %v503_v7 }
 0x19d   : > { %504 = vst [vmem:[%s340_s8] sm:$0xff] %v502_v8 }
 0x19e   : > { %986 = shalt.err (!%p983_p11)
}
 0x19f   : > { %s987_s13 = scalar_lea.hbm %s1374_s7, 256  ;;  %s991_s2 = scalar_lea.hbm %s1428_s5, 512 }
 0x1a0   : > { %p988_p10 = scmp.ne.s32.totalorder %s1374_s7, %s987_s13  ;;  %p992_p0 = scmp.lt.u32.totalorder %s1374_s7, %s1428_s5 }
 0x1a1   : > { %p993_p6 = scmp.lt.u32.totalorder %s991_s2, %s987_s13  ;;  %p995_p9 = scmp.lt.u32.totalorder %s987_s13, %s1374_s7 }
 0x1a2   : > { %p989_p8 = pnand %p988_p10, %p1469_p13 }
 0x1a3   : > { %p994_p3 = por %p993_p6, %p992_p0 }
 0x1a4   : > { %p990_p7 = pneg %p989_p8 }
 0x1a5   : > { %p996_p4 = por %p995_p9, %p994_p3 }
 0x1a7   : > { %p997_p5 = pnand %p996_p4, %p990_p7 }
 0x1a9   : > { %1000 = shalt.err (!%p997_p5)
}
 0x1aa   : > { %s1076_s6 = smov 128   ;;  %s1077_s9 = smov 8  }
 0x1ab   : > { %776 = dma.vmem_to_hbm [thread:$0]  (%p1469_p13), %s1369_s11, 256, %s1374_s7, %s507_s10, %s1076_s6, %s1076_s6, %s1077_s9  }
 0x1ac PF: > { %s1470_s24 = sld [smem:[#allocation17_spill]]  ;;  %s1471_s28 = sld [smem:[#allocation18_spill]] }
 0x1ad   : > { %p1473_p2 = scmp.ge.s32.totalorder %s1067_s23, 2 }
 0x1b2   : > { %s537_s8 = sand.u32 1, %s1470_s24   ;;  %p1472_p12 = scmp.ne.s32.totalorder %s1471_s28, 0 }
 0x1b3   : > { %s538_s16 = scalar_lea.sflag [#allocation5], %s537_s8 }
 0x1b4   : > { %p793_p1 = pnand %p1473_p2, %p1472_p12 }
 0x1b6   : > { %1042 = dma.done.wait (!%p793_p1), %s538_s16, 256  }
 0x1b7   : > { %1044 = vsyncadd (!%p793_p1), %s538_s16, 4294967040  ;;  %s25_s23 = sadd.s32 1, %s1067_s23   ;;  %s1474_s29 = sld [smem:[#allocation19_spill]] }
 0x1b8   : > { %p22_p11 = scmp.ge.s32.totalorder %s25_s23, 4   ;;  %s1475_s18 = smov %s1051_s19 }
 0x1b9   : > { %s1476_s19 = smov %s1055_s20  ;;  %s1477_s20 = smov %s1302_s14 }
 0x1ba   : > { %s1478_s21 = smov %s1063_s22  ;;  %24 = sbr.rel (!%p22_p11) target bundleno = 13 (0xd), region = 106 }
 0x1bd   : > { %s1479_s22 = smov %s1474_s29 }
 0x1c1   :  { %543 = vsyncpa [#allocation4], 1 }
 0x1c2   :  { %545 = vsyncpa [#allocation4 + $0x1], 1 }
 0x1c3   :  { %546 = vsyncpa [#allocation7], 1 }
 0x1c4   :  { %548 = vsyncpa [#allocation7 + $0x1], 1 }
 0x1c5   :  { %549 = vsyncpa [#allocation10], 1 }
 0x1c6   :  { %550 = vsyncpa [#allocation5], 1 }
 0x1c7   :  { %552 = vsyncpa [#allocation5 + $0x1], 1 }

</bundles_post_ra>
